<compile_context>
chip_gen: v6e
topology: v6e:2x2x1
jax: 0.10.0
libtpu: 0.0.40
codegen_flags: <defaults>
</compile_context>

<pallas_src>
import functools

import jax
import jax.numpy as jnp
from jax.experimental import pallas as pl
from jax.experimental.pallas import tpu as pltpu

EPS = 1e-5            # PyTorch BatchNorm1d default eps
LANE = 128            # TPU lane width
BF16_SUBLANE = 16     # bf16 sublane packing (2 x 8 rows per vreg)


def _round_up(n, m):
    return ((n + m - 1) // m) * m


# -----------------------------------------------------------------------------
# Kernel: fused 4-layer MLP (BN already folded into the weights/biases).
# -----------------------------------------------------------------------------
def _ann_kernel(x_ref, w1_ref, w2_ref, w3_ref, w4_ref, b_ref, out_ref,
                *, n1, n2, n3, n4):
    """x_ref: (TB, Kpad) bf16; w*_ref: padded bf16 weights; b_ref: (4, FMAX) f32."""
    b = b_ref[...]                                   # read once; f32 epilogue params

    # fc1 (+ folded bn1) -> relu      (dropout = identity in eval mode)
    h = jnp.dot(x_ref[...], w1_ref[...], preferred_element_type=jnp.float32)
    h = jnp.maximum(h + b[0:1, :n1], 0.0)

    # fc2 (+ folded bn2) -> relu
    h = jnp.dot(h.astype(jnp.bfloat16), w2_ref[...],
                preferred_element_type=jnp.float32)
    h = jnp.maximum(h + b[1:2, :n2], 0.0)

    # fc3 (+ folded bn3) -> relu
    h = jnp.dot(h.astype(jnp.bfloat16), w3_ref[...],
                preferred_element_type=jnp.float32)
    h = jnp.maximum(h + b[2:3, :n3], 0.0)

    # fc4 -> bf16 lane-dense store (halves HBM writeback vs f32)
    out = jnp.dot(h.astype(jnp.bfloat16), w4_ref[...],
                  preferred_element_type=jnp.float32)
    out_ref[...] = (out + b[3:4, :n4]).astype(out_ref.dtype)


# -----------------------------------------------------------------------------
# Parameter construction (PyTorch-like, f32) + BN-fold / pad / bf16 prep.
# -----------------------------------------------------------------------------
def make_params(key, input_size, hidden_size, output_size):
    """Deterministic parameters mirroring AnnModel.__init__ shapes (f32)."""
    dims = [
        (input_size, hidden_size * 2),    # fc1
        (hidden_size * 2, hidden_size),   # fc2
        (hidden_size, hidden_size // 2),  # fc3
        (hidden_size // 2, output_size),  # fc4
    ]
    params = {}
    keys = jax.random.split(key, 16)
    ki = 0
    for li, (fin, fout) in enumerate(dims, start=1):
        params[f"w{li}"] = (jax.random.normal(keys[ki], (fin, fout), jnp.float32)
                            * (1.0 / jnp.sqrt(fin))); ki += 1
        params[f"b{li}"] = (jax.random.normal(keys[ki], (1, fout), jnp.float32)
                            * 0.01); ki += 1
        if li <= 3:  # BatchNorm params / running stats for bn1..bn3
            params[f"g{li}"]  = 1.0 + 0.1 * jax.random.normal(keys[ki], (1, fout), jnp.float32); ki += 1
            params[f"be{li}"] = 0.1 * jax.random.normal(keys[ki], (1, fout), jnp.float32); ki += 1
            params[f"m{li}"]  = 0.05 * jnp.arange(fout, dtype=jnp.float32).reshape(1, fout) / fout
            params[f"v{li}"]  = 1.0 + 0.02 * jnp.arange(fout, dtype=jnp.float32).reshape(1, fout) / fout
    return params


def fold_and_pad_params(p, input_size, hidden_size, output_size):
    """Fold eval-mode BN into the linears; pad layer widths to 128 lanes (the
    input feature dim only to the bf16 sublane tile); cast weights to bf16."""
    dims = [input_size, hidden_size * 2, hidden_size, hidden_size // 2, output_size]
    pdims = [_round_up(dims[0], BF16_SUBLANE)] + [_round_up(d, LANE) for d in dims[1:]]
    fmax = max(pdims[1:])

    fused_w, fused_b = [], []
    for li in range(1, 5):
        w = p[f"w{li}"]                         # (fin, fout)  f32
        b = p[f"b{li}"][0]                      # (fout,)      f32
        if li <= 3:                             # fold eval-mode BatchNorm
            s = p[f"g{li}"][0] * jax.lax.rsqrt(p[f"v{li}"][0] + EPS)
            w = w * s[None, :]
            b = (b - p[f"m{li}"][0]) * s + p[f"be{li}"][0]
        fin, fout = dims[li - 1], dims[li]
        wpad = jnp.zeros((pdims[li - 1], pdims[li]), jnp.float32)
        wpad = wpad.at[:fin, :fout].set(w)
        bpad = jnp.zeros((fmax,), jnp.float32).at[:fout].set(b)
        fused_w.append(wpad.astype(jnp.bfloat16))   # bf16 MXU operands
        fused_b.append(bpad)                        # f32 epilogue params

    return {
        "w": fused_w,                        # 4 padded bf16 weights
        "bias": jnp.stack(fused_b, axis=0),  # (4, FMAX) f32, single DMA
        "dims": dims,
        "pdims": pdims,
    }


# -----------------------------------------------------------------------------
# Wrapper
# -----------------------------------------------------------------------------
def ann_forward(x, prep, *, tb=None):
    """Run the batch-tiled fused kernel; returns (batch, output_size) f32."""
    batch, in_feat = x.shape
    dims, pdims = prep["dims"], prep["pdims"]
    k_pad, out_pad = pdims[0], pdims[4]
    out_size = dims[4]

    # Batch-tile policy: multiples of 16 rows (bf16 packing, unmasked loads),
    # >= 2 grid steps whenever batch allows (feeds both v7x TensorCores via the
    # "parallel" axis), capped at 1024 rows to amortize per-step overhead.
    if tb is None:
        tb = max(BF16_SUBLANE,
                 min(1024, _round_up(pl.cdiv(batch, 2), BF16_SUBLANE)))
    else:
        tb = max(BF16_SUBLANE, _round_up(tb, BF16_SUBLANE))
    batch_pad = _round_up(batch, tb)

    # Cast to bf16 FIRST, then pad (batch rows + input features only to the
    # bf16 sublane tile) in one fused op -- no full-size f32 intermediate and
    # no 128-lane inflation of the x stream in HBM.
    xp = jnp.pad(x.astype(jnp.bfloat16),
                 ((0, batch_pad - batch), (0, k_pad - in_feat)))

    w1, w2, w3, w4 = prep["w"]
    bias = prep["bias"]
    nb, fmax = bias.shape

    # Resident (constant-index_map) operands: weights + packed biases.  Once
    # their footprint is big enough to matter, single-buffer them (halves
    # resident VMEM on v7x as hidden_size grows).  At toy sizes default
    # double-buffering is harmless, so keep the plain path there.
    weight_bytes = sum(int(w.size) * 2 for w in (w1, w2, w3, w4))
    single_buffer = weight_bytes > (4 << 20)

    def resident_spec(shape):
        if single_buffer:
            return pl.BlockSpec(shape, lambda i: (0, 0),
                                pipeline_mode=pl.Buffered(1))
        return pl.BlockSpec(shape, lambda i: (0, 0))

    # Explicit VMEM budget: resident weights/bias (+ buffers) + pipelined
    # x/out tiles + headroom for f32 intermediates.
    w_bufs = 1 if single_buffer else 2
    est_vmem = (w_bufs * weight_bytes + 2 * int(bias.size) * 4
                + 2 * tb * k_pad * 2 + 2 * tb * out_pad * 2
                + 4 * tb * fmax * 4)
    vmem_limit = int(min(max(16 << 20, int(est_vmem * 1.25)), 96 << 20))

    kernel = functools.partial(
        _ann_kernel, n1=pdims[1], n2=pdims[2], n3=pdims[3], n4=pdims[4])

    out = pl.pallas_call(
        kernel,
        out_shape=jax.ShapeDtypeStruct((batch_pad, out_pad), jnp.bfloat16),
        grid=(batch_pad // tb,),
        in_specs=[
            pl.BlockSpec((tb, k_pad), lambda i: (i, 0)),   # x: tiled over batch
            resident_spec(w1.shape),                       # weights: resident
            resident_spec(w2.shape),
            resident_spec(w3.shape),
            resident_spec(w4.shape),
            resident_spec((nb, fmax)),                     # packed f32 biases
        ],
        out_specs=pl.BlockSpec((tb, out_pad), lambda i: (i, 0)),
        compiler_params=pltpu.CompilerParams(
            dimension_semantics=("parallel",),   # shard batch over v7x's 2 TCs
            vmem_limit_bytes=vmem_limit,
        ),
    )(xp, w1, w2, w3, w4, bias)

    # Valid rows / columns only; tiny after the slice, so the f32 cast is free.
    return out[:batch, :out_size].astype(jnp.float32)


# -----------------------------------------------------------------------------
# Pure-JAX f32 reference (unfused, original PyTorch semantics in eval mode).
# -----------------------------------------------------------------------------
def ann_reference(x, p):
    def bn(h, g, be, m, v):
        return (h - m) * jax.lax.rsqrt(v + EPS) * g + be
    h = jnp.maximum(bn(x @ p["w1"] + p["b1"], p["g1"], p["be1"], p["m1"], p["v1"]), 0.0)
    h = jnp.maximum(bn(h @ p["w2"] + p["b2"], p["g2"], p["be2"], p["m2"], p["v2"]), 0.0)
    h = jnp.maximum(bn(h @ p["w3"] + p["b3"], p["g3"], p["be3"], p["m3"], p["v3"]), 0.0)
    return h @ p["w4"] + p["b4"]


if __name__ == "__main__":
    # Small shapes consistent with the module: batch=8, input=16, hidden=32, output=4.
    # NOTE: at these toy shapes the call is launch/DMA-latency bound; batching
    # multiple inference requests into one ann_forward call is the lever that
    # changes wall clock (the kernel itself scales with batch/hidden).
    batch, input_size, hidden_size, output_size = 8, 16, 32, 4

    key = jax.random.PRNGKey(0)
    kx, kp = jax.random.split(key)
    x = jax.random.normal(kx, (batch, input_size), jnp.float32)

    params = make_params(kp, input_size, hidden_size, output_size)
    prep = fold_and_pad_params(params, input_size, hidden_size, output_size)

    out = ann_forward(x, prep)
    out = jax.block_until_ready(out)

    ref = ann_reference(x, params)
    assert out.shape == (batch, output_size)
    # bf16 MXU operands, bf16-folded BN scales and a bf16 output tile shift
    # results at the ~1e-2 level vs the f32 unfused reference.
    assert jnp.allclose(out, ref, atol=5e-2, rtol=5e-2), "mismatch vs pure-JAX reference"

    print("KERNEL_OK")
</pallas_src>

<mosaic_0001>
module attributes {stable_mosaic.version = 11 : i64} {
  func.func @_ann_kernel(%arg0: i32, %arg1: memref<16x16xbf16, #tpu.memory_space<vmem>>, %arg2: memref<16x128xbf16, #tpu.memory_space<vmem>>, %arg3: memref<128x128xbf16, #tpu.memory_space<vmem>>, %arg4: memref<128x128xbf16, #tpu.memory_space<vmem>>, %arg5: memref<128x128xbf16, #tpu.memory_space<vmem>>, %arg6: memref<4x128xf32, #tpu.memory_space<vmem>>, %arg7: memref<16x128xbf16, #tpu.memory_space<vmem>>) attributes {dimension_semantics = [#tpu.dimension_semantics<parallel>], iteration_bounds = array<i64: 1>, scalar_prefetch = 0 : i64, scratch_operands = 0 : i64, tpu.core_type = #tpu.core_type<tc>, window_params = [{transform_indices = @transform_0, window_bounds = array<i64: 16, 16>}, {pipeline_mode = #tpu.pipeline_mode<synchronous>, transform_indices = @transform_1, window_bounds = array<i64: 16, 128>}, {pipeline_mode = #tpu.pipeline_mode<synchronous>, transform_indices = @transform_2, window_bounds = array<i64: 128, 128>}, {pipeline_mode = #tpu.pipeline_mode<synchronous>, transform_indices = @transform_3, window_bounds = array<i64: 128, 128>}, {pipeline_mode = #tpu.pipeline_mode<synchronous>, transform_indices = @transform_4, window_bounds = array<i64: 128, 128>}, {pipeline_mode = #tpu.pipeline_mode<synchronous>, transform_indices = @transform_5, window_bounds = array<i64: 4, 128>}, {transform_indices = @transform_6, window_bounds = array<i64: 16, 128>}]} {
    %c0 = arith.constant 0 : index
    %c0_0 = arith.constant 0 : index
    %0 = vector.load %arg6[%c0, %c0_0] : memref<4x128xf32, #tpu.memory_space<vmem>>, vector<4x128xf32>
    %c0_1 = arith.constant 0 : index
    %c0_2 = arith.constant 0 : index
    %1 = vector.load %arg1[%c0_1, %c0_2] : memref<16x16xbf16, #tpu.memory_space<vmem>>, vector<16x16xbf16>
    %c0_3 = arith.constant 0 : index
    %c0_4 = arith.constant 0 : index
    %2 = vector.load %arg2[%c0_3, %c0_4] : memref<16x128xbf16, #tpu.memory_space<vmem>>, vector<16x128xbf16>
    %cst = arith.constant dense<0.000000e+00> : vector<16x128xf32>
    %3 = tpu.matmul %1, %2, %cst {dimension_numbers = #tpu.dot_dimension_numbers<[1], [0], [0], [1], [0, 0, 1, 1], [], []>} : vector<16x16xbf16>, vector<16x128xbf16>, vector<16x128xf32> -> vector<16x128xf32>
    %4 = vector.extract_strided_slice %0 {offsets = [0, 0], sizes = [1, 128], strides = [1, 1]} : vector<4x128xf32> to vector<1x128xf32>
    %5 = vector.broadcast %4 : vector<1x128xf32> to vector<16x128xf32>
    %6 = arith.addf %3, %5 : vector<16x128xf32>
    %cst_5 = arith.constant 0.000000e+00 : f32
    %7 = vector.broadcast %cst_5 : f32 to vector<16x128xf32>
    %8 = arith.maximumf %6, %7 : vector<16x128xf32>
    %9 = arith.truncf %8 : vector<16x128xf32> to vector<16x128xbf16>
    %c0_6 = arith.constant 0 : index
    %c0_7 = arith.constant 0 : index
    %10 = vector.load %arg3[%c0_6, %c0_7] : memref<128x128xbf16, #tpu.memory_space<vmem>>, vector<128x128xbf16>
    %cst_8 = arith.constant dense<0.000000e+00> : vector<16x128xf32>
    %11 = tpu.matmul %9, %10, %cst_8 {dimension_numbers = #tpu.dot_dimension_numbers<[1], [0], [0], [1], [0, 0, 1, 1], [], []>} : vector<16x128xbf16>, vector<128x128xbf16>, vector<16x128xf32> -> vector<16x128xf32>
    %12 = vector.extract_strided_slice %0 {offsets = [1, 0], sizes = [1, 128], strides = [1, 1]} : vector<4x128xf32> to vector<1x128xf32>
    %13 = vector.broadcast %12 : vector<1x128xf32> to vector<16x128xf32>
    %14 = arith.addf %11, %13 : vector<16x128xf32>
    %cst_9 = arith.constant 0.000000e+00 : f32
    %15 = vector.broadcast %cst_9 : f32 to vector<16x128xf32>
    %16 = arith.maximumf %14, %15 : vector<16x128xf32>
    %17 = arith.truncf %16 : vector<16x128xf32> to vector<16x128xbf16>
    %c0_10 = arith.constant 0 : index
    %c0_11 = arith.constant 0 : index
    %18 = vector.load %arg4[%c0_10, %c0_11] : memref<128x128xbf16, #tpu.memory_space<vmem>>, vector<128x128xbf16>
    %cst_12 = arith.constant dense<0.000000e+00> : vector<16x128xf32>
    %19 = tpu.matmul %17, %18, %cst_12 {dimension_numbers = #tpu.dot_dimension_numbers<[1], [0], [0], [1], [0, 0, 1, 1], [], []>} : vector<16x128xbf16>, vector<128x128xbf16>, vector<16x128xf32> -> vector<16x128xf32>
    %20 = vector.extract_strided_slice %0 {offsets = [2, 0], sizes = [1, 128], strides = [1, 1]} : vector<4x128xf32> to vector<1x128xf32>
    %21 = vector.broadcast %20 : vector<1x128xf32> to vector<16x128xf32>
    %22 = arith.addf %19, %21 : vector<16x128xf32>
    %cst_13 = arith.constant 0.000000e+00 : f32
    %23 = vector.broadcast %cst_13 : f32 to vector<16x128xf32>
    %24 = arith.maximumf %22, %23 : vector<16x128xf32>
    %25 = arith.truncf %24 : vector<16x128xf32> to vector<16x128xbf16>
    %c0_14 = arith.constant 0 : index
    %c0_15 = arith.constant 0 : index
    %26 = vector.load %arg5[%c0_14, %c0_15] : memref<128x128xbf16, #tpu.memory_space<vmem>>, vector<128x128xbf16>
    %cst_16 = arith.constant dense<0.000000e+00> : vector<16x128xf32>
    %27 = tpu.matmul %25, %26, %cst_16 {dimension_numbers = #tpu.dot_dimension_numbers<[1], [0], [0], [1], [0, 0, 1, 1], [], []>} : vector<16x128xbf16>, vector<128x128xbf16>, vector<16x128xf32> -> vector<16x128xf32>
    %28 = vector.extract_strided_slice %0 {offsets = [3, 0], sizes = [1, 128], strides = [1, 1]} : vector<4x128xf32> to vector<1x128xf32>
    %29 = vector.broadcast %28 : vector<1x128xf32> to vector<16x128xf32>
    %30 = arith.addf %27, %29 : vector<16x128xf32>
    %31 = arith.truncf %30 : vector<16x128xf32> to vector<16x128xbf16>
    %c0_17 = arith.constant 0 : index
    %c0_18 = arith.constant 0 : index
    %32 = vector.load %arg7[%c0_17, %c0_18] : memref<16x128xbf16, #tpu.memory_space<vmem>>, vector<16x128xbf16>
    tpu.vector_store %arg7[%c0_17, %c0_18], %31 {strides = array<i32>} : memref<16x128xbf16, #tpu.memory_space<vmem>>, vector<16x128xbf16>,
    return
  }
  func.func @transform_0(%arg0: i32) -> (i32, i32) {
    %c0_i32 = arith.constant 0 : i32
    %c0_i32_0 = arith.constant 0 : i32
    return %arg0, %c0_i32 : i32, i32
  }
  func.func @transform_1(%arg0: i32) -> (i32, i32) {
    %c0_i32 = arith.constant 0 : i32
    %c0_i32_0 = arith.constant 0 : i32
    %c0_i32_1 = arith.constant 0 : i32
    return %c0_i32, %c0_i32_0 : i32, i32
  }
  func.func @transform_2(%arg0: i32) -> (i32, i32) {
    %c0_i32 = arith.constant 0 : i32
    %c0_i32_0 = arith.constant 0 : i32
    %c0_i32_1 = arith.constant 0 : i32
    return %c0_i32, %c0_i32_0 : i32, i32
  }
  func.func @transform_3(%arg0: i32) -> (i32, i32) {
    %c0_i32 = arith.constant 0 : i32
    %c0_i32_0 = arith.constant 0 : i32
    %c0_i32_1 = arith.constant 0 : i32
    return %c0_i32, %c0_i32_0 : i32, i32
  }
  func.func @transform_4(%arg0: i32) -> (i32, i32) {
    %c0_i32 = arith.constant 0 : i32
    %c0_i32_0 = arith.constant 0 : i32
    %c0_i32_1 = arith.constant 0 : i32
    return %c0_i32, %c0_i32_0 : i32, i32
  }
  func.func @transform_5(%arg0: i32) -> (i32, i32) {
    %c0_i32 = arith.constant 0 : i32
    %c0_i32_0 = arith.constant 0 : i32
    %c0_i32_1 = arith.constant 0 : i32
    return %c0_i32, %c0_i32_0 : i32, i32
  }
  func.func @transform_6(%arg0: i32) -> (i32, i32) {
    %c0_i32 = arith.constant 0 : i32
    %c0_i32_0 = arith.constant 0 : i32
    return %arg0, %c0_i32 : i32, i32
  }
}

</mosaic_0001>

<bundles_post_ra>
// kernel: tpu_custom_call.1
= control target key start
LH: loop header
LB: loop body
LE: loop exit
PB: predicated region body
PF: predicated region fallthrough
CT: control target
= control target key end

     0   :  { %11 = vsyncpa [#allocation3], 0  ;;  %s947_s0 = inlined_call_operand.hbm [shape: bf16[16,16], index: 0, kind: input, shape index: {}]   ;;  %s948_s1 = inlined_call_operand.hbm [shape: bf16[16,128], index: 1, kind: input, shape index: {}]   ;;  %s949_s2 = inlined_call_operand.hbm [shape: bf16[128,128], index: 2, kind: input, shape index: {}]   ;;  %s950_s3 = inlined_call_operand.hbm [shape: bf16[128,128], index: 3, kind: input, shape index: {}]   ;;  %s951_s4 = inlined_call_operand.hbm [shape: bf16[128,128], index: 4, kind: input, shape index: {}]   ;;  %s952_s5 = inlined_call_operand.vmem [shape: f32[4,128], index: 5, kind: input, shape index: {}]   ;;  %s953_s6 = inlined_call_operand.hbm [shape: bf16[16,128], index: 6, kind: output, shape index: {}]  }
   0x1   :  { %12 = vsyncpa [#allocation6], 0 }
   0x2   :  { %13 = vsyncpa [#allocation9], 0 }
   0x3   :  { %14 = vsyncpa [#allocation4], 0  ;;  %s818_s21 = smov [#allocation5]   ;;  %s819_s23 = smov [#allocation8]  }
   0x4   :  { %s32_s22 = sshll.u32 %s818_s21, 4  ;;  %s56_s24 = sshll.u32 %s819_s23, 4  ;;  %s33_s22 = int_to_ptr.vmem [resolvable:$true] %s32_s22  ;;  %s57_s24 = int_to_ptr.vmem [resolvable:$true] %s56_s24 }
   0x5   :  { %s698_s25 = scalar_lea.vmem %s33_s22, 128  ;;  %p703_p1 = scmp.lt.s32.totalorder %s33_s22, %s33_s22 }
   0x6   :  { %p699_p0 = scmp.ne.s32.totalorder %s33_s22, %s698_s25  ;;  %p704_p2 = scmp.lt.s32.totalorder %s698_s25, %s698_s25 }
   0x8   :  { %p705_p3 = por %p704_p2, %p703_p1 }
   0xa   :  { %p706_p4 = pnand %p705_p3, %p699_p0 }
   0xc   :  { %709 = shalt.err (!%p706_p4)
}
   0xd   :  { %s820_s26 = smov 64   ;;  %s821_s27 = smov 4  }
   0xe   :  { %38 = dma.hbm_to_vmem [thread:$0]  %s948_s1, 128, %s33_s22, [#allocation6], %s820_s26, %s820_s26, %s821_s27  }
   0xf   :  { %s718_s30 = scalar_lea.vmem %s57_s24, 1024  ;;  %p723_p6 = scmp.lt.s32.totalorder %s57_s24, %s57_s24 }
  0x10   :  { %p719_p5 = scmp.ne.s32.totalorder %s57_s24, %s718_s30  ;;  %p724_p7 = scmp.lt.s32.totalorder %s718_s30, %s718_s30 }
  0x12   :  { %p725_p8 = por %p724_p7, %p723_p6 }
  0x14   :  { %p726_p9 = pnand %p725_p8, %p719_p5 }
  0x16   :  { %729 = shalt.err (!%p726_p9)
}
  0x17   :  { %62 = dma.hbm_to_vmem [thread:$0]  %s950_s3, 1024, %s57_s24, [#allocation9], %s820_s26, %s820_s26, %s821_s27  }
  0x18   :  { %s822_s9 = smov [#allocation2]   ;;  %s823_s11 = smov [#allocation7]  }
  0x19   :  { %s20_s10 = sshll.u32 %s822_s9, 4  ;;  %s44_s12 = sshll.u32 %s823_s11, 4  ;;  %s21_s10 = int_to_ptr.vmem [resolvable:$true] %s20_s10  ;;  %s45_s12 = int_to_ptr.vmem [resolvable:$true] %s44_s12 }
  0x1a   :  { %s738_s1 = scalar_lea.vmem %s21_s10, 128  ;;  %p743_p11 = scmp.lt.s32.totalorder %s21_s10, %s21_s10 }
  0x1b   :  { %p739_p10 = scmp.ne.s32.totalorder %s21_s10, %s738_s1  ;;  %p744_p12 = scmp.lt.s32.totalorder %s738_s1, %s738_s1 }
  0x1d   :  { %p745_p13 = por %p744_p12, %p743_p11 }
  0x1f   :  { %p746_p0 = pnand %p745_p13, %p739_p10 }
  0x21   :  { %749 = shalt.err (!%p746_p0)
}
  0x22   :  { %26 = dma.hbm_to_vmem [thread:$0]  %s947_s0, 128, %s21_s10, [#allocation3], %s820_s26, %s820_s26, %s821_s27  }
  0x23   :  { %s758_s3 = scalar_lea.vmem %s45_s12, 1024  ;;  %p763_p2 = scmp.lt.s32.totalorder %s45_s12, %s45_s12 }
  0x24   :  { %p759_p1 = scmp.ne.s32.totalorder %s45_s12, %s758_s3  ;;  %p764_p3 = scmp.lt.s32.totalorder %s758_s3, %s758_s3 }
  0x26   :  { %p765_p4 = por %p764_p3, %p763_p2 }
  0x28   :  { %p766_p5 = pnand %p765_p4, %p759_p1 }
  0x2a   :  { %769 = shalt.err (!%p766_p5)
}
  0x2b   :  { %50 = dma.hbm_to_vmem [thread:$0]  %s949_s2, 1024, %s45_s12, [#allocation6], %s820_s26, %s820_s26, %s821_s27  }
  0x2c   :  { %s824_s17 = smov [#allocation10]  }
  0x2d   :  { %s68_s18 = sshll.u32 %s824_s17, 4  ;;  %s69_s18 = int_to_ptr.vmem [resolvable:$true] %s68_s18 }
  0x2e   :  { %s778_s19 = scalar_lea.vmem %s69_s18, 1024  ;;  %p783_p7 = scmp.lt.s32.totalorder %s69_s18, %s69_s18 }
  0x2f   :  { %p779_p6 = scmp.ne.s32.totalorder %s69_s18, %s778_s19  ;;  %p784_p8 = scmp.lt.s32.totalorder %s778_s19, %s778_s19 }
  0x31   :  { %p785_p9 = por %p784_p8, %p783_p7 }
  0x33   :  { %p786_p10 = pnand %p785_p9, %p779_p6 }
  0x35   :  { %789 = shalt.err (!%p786_p10)
}
  0x36   :  { %74 = dma.hbm_to_vmem [thread:$0]  %s951_s4, 1024, %s69_s18, [#allocation9], %s820_s26, %s820_s26, %s821_s27  }
  0x37   :  { %810 = dma.done.wait [#allocation3], 128  }
  0x38   :  { %811 = vsyncadd [#allocation3], 4294967168 }
  0x39   :  { %812 = dma.done.wait [#allocation6], 1152  }
  0x3a   :  { %813 = vsyncadd [#allocation6], 4294966144 }
  0x3b   :  { %814 = dma.done.wait [#allocation9], 2048  }
  0x3c   :  { %815 = vsyncadd [#allocation9], 4294965248  ;;  %v825_v0 = vmov 0.0   ;;  %vm826_vm0 = vmmov 0   ;;  %v664_v1 = vld [vmem:[#allocation5] sm:$0xff]   ;;  %v665_v2 = vld [vmem:[#allocation2] sm:$0xff]   ;;  %v98_v16 = vlaneseq }
  0x3d   :  { %588 = vmatprep.subr.bf16.mxu0 %v825_v0  ;;  %590 = vmatprep.mubr.msk.bf16.mxu0 %vm826_vm0, %v825_v0  ;;  %vm113_vm1 = vcmask 130048   ;;  %v666_v3 = vld [vmem:[#allocation7 + $0x38] sm:$0xff]   ;;  %v667_v4 = vld [vmem:[#allocation7 + $0x30] sm:$0xff]   ;;  %v668_v5 = vld [vmem:[#allocation7 + $0x28] sm:$0xff]  }
  0x3e   :  { %594 = vmatprep.subr.bf16.mxu1 %v825_v0  ;;  %610 = vmatprep.mubr.msk.bf16.mxu1 %vm826_vm0, %v825_v0  ;;  %v669_v6 = vld [vmem:[#allocation7 + $0x20] sm:$0xff]   ;;  %v670_v7 = vld [vmem:[#allocation7 + $0x18] sm:$0xff]   ;;  %v671_v8 = vld [vmem:[#allocation7 + $0x10] sm:$0xff]   ;;  %v915_v17 = vshrl.u32 %v98_v16, 7 }
  0x3f   :  { %589 = vmatpush3.bf16.msra.mxu0 %v664_v1  ;;  %595 = vmatpush3.bf16.msra.mxu1 %v666_v3  ;;  %v672_v9 = vld [vmem:[#allocation7 + $0x8] sm:$0xff]   ;;  %v673_v10 = vld [vmem:[#allocation7] sm:$0xff]   ;;  %v674_v11 = vld [vmem:[#allocation8 + $0x38] sm:$0xff]  }
  0x40   :  { %614 = vmatprep.subr.bf16.mxu0 %v825_v0  ;;  %596 = vmatprep.subr.bf16.mxu1 %v825_v0  ;;  %v675_v12 = vld [vmem:[#allocation8 + $0x30] sm:$0xff]   ;;  %v676_v13 = vld [vmem:[#allocation8 + $0x28] sm:$0xff]   ;;  %v677_v14 = vld [vmem:[#allocation8 + $0x20] sm:$0xff]   ;;  %v100_v18 = vsub.s32 0, %v915_v17  ;;  %v179_v38 = vsub.s32 1, %v915_v17  ;;  %v291_v52 = vsub.s32 2, %v915_v17 }
  0x41   :  { %v678_v15 = vld [vmem:[#allocation8 + $0x18] sm:$0xff]   ;;  %v921_v19 = vld [vmem:[%s952_s5] sm:$0xf]  ;;  %v680_v31 = vld [vmem:[#allocation8 + $0x8] sm:$0xff]   ;;  %v403_v63 = vsub.s32 3, %v915_v17  ;;  %s827_s5 = smov [#allocation11]  }
  0x42   :  { %591 = vmatmul.mubr.msk.bf16.vlgmr.msra.gmra.mxu0 %vm113_vm1, %v665_v2  ;;  %v101_v20 = vrot.slane %v921_v19, %v100_v18  ;;  %v679_v30 = vld [vmem:[#allocation8 + $0x10] sm:$0xff]   ;;  %v681_v32 = vld [vmem:[#allocation8] sm:$0xff]   ;;  %v682_v33 = vld [vmem:[#allocation10 + $0x38] sm:$0xff]   ;;  %v180_v39 = vrot.slane %v921_v19, %v179_v38  ;;  %v292_v53 = vrot.slane %v921_v19, %v291_v52  ;;  %s509_s21 = sshll.u32 %s827_s5, 4  ;;  %s510_s21 = int_to_ptr.vmem [resolvable:$true] %s509_s21 }
  0x43   :  { %630 = vmatprep.mubr.msk.bf16.mxu0 %vm826_vm0, %v825_v0  ;;  %597 = vmatpush3.bf16.msra.mxu1 %v667_v4  ;;  %v683_v34 = vld [vmem:[#allocation10 + $0x30] sm:$0xff]   ;;  %v684_v35 = vld [vmem:[#allocation10 + $0x28] sm:$0xff]   ;;  %v685_v36 = vld [vmem:[#allocation10 + $0x20] sm:$0xff]   ;;  %s790_s22 = scalar_lea.vmem %s510_s21, 128  ;;  %p795_p12 = scmp.lt.s32.totalorder %s510_s21, %s510_s21 }
  0x44   :  { %598 = vmatprep.subr.bf16.mxu1 %v825_v0  ;;  %615 = vmatpush3.bf16.msra.mxu0 %v674_v11  ;;  %v686_v37 = vld [vmem:[#allocation10 + $0x18] sm:$0xff]   ;;  %v687_v49 = vld [vmem:[#allocation10 + $0x10] sm:$0xff]   ;;  %v688_v50 = vld [vmem:[#allocation10 + $0x8] sm:$0xff]   ;;  %p791_p11 = scmp.ne.s32.totalorder %s510_s21, %s790_s22  ;;  %p796_p13 = scmp.lt.s32.totalorder %s790_s22, %s790_s22 }
  0x45   :  { %616 = vmatprep.subr.bf16.mxu0 %v825_v0  ;;  %v689_v51 = vld [vmem:[#allocation10] sm:$0xff]  }
  0x46   :  { %p797_p0 = por %p796_p13, %p795_p12 }
  0x47   :  { %599 = vmatpush3.bf16.msra.mxu1 %v668_v5 }
  0x48   :  { %600 = vmatprep.subr.bf16.mxu1 %v825_v0  ;;  %617 = vmatpush3.bf16.msra.mxu0 %v675_v12  ;;  %p798_p1 = pnand %p797_p0, %p791_p11 }
  0x49   :  { %618 = vmatprep.subr.bf16.mxu0 %v825_v0 }
  0x4b   :  { %601 = vmatpush3.bf16.msra.mxu1 %v669_v6 }
  0x4c   :  { %602 = vmatprep.subr.bf16.mxu1 %v825_v0  ;;  %619 = vmatpush3.bf16.msra.mxu0 %v676_v13 }
  0x4d   :  { %620 = vmatprep.subr.bf16.mxu0 %v825_v0 }
  0x4f   :  { %603 = vmatpush3.bf16.msra.mxu1 %v670_v7 }
  0x50   :  { %604 = vmatprep.subr.bf16.mxu1 %v825_v0  ;;  %621 = vmatpush3.bf16.msra.mxu0 %v677_v14 }
  0x51   :  { %622 = vmatprep.subr.bf16.mxu0 %v825_v0 }
  0x53   :  { %605 = vmatpush3.bf16.msra.mxu1 %v671_v8 }
  0x54   :  { %606 = vmatprep.subr.bf16.mxu1 %v825_v0  ;;  %623 = vmatpush3.bf16.msra.mxu0 %v678_v15 }
  0x55   :  { %624 = vmatprep.subr.bf16.mxu0 %v825_v0 }
  0x57   :  { %607 = vmatpush3.bf16.msra.mxu1 %v672_v9 }
  0x58   :  { %608 = vmatprep.subr.bf16.mxu1 %v825_v0  ;;  %625 = vmatpush3.bf16.msra.mxu0 %v679_v30 }
  0x59   :  { %626 = vmatprep.subr.bf16.mxu0 %v825_v0 }
  0x5b   :  { %609 = vmatpush3.bf16.msra.mxu1 %v673_v10 }
  0x5c   :  { %634 = vmatprep.subr.bf16.mxu1 %v825_v0  ;;  %627 = vmatpush3.bf16.msra.mxu0 %v680_v31 }
  0x5d   :  { %628 = vmatprep.subr.bf16.mxu0 %v825_v0 }
  0x60   :  { %629 = vmatpush3.bf16.msra.mxu0 %v681_v32 }
 0x102   :  { %v151_v21 = vpop.f32.mrf.mxu0 }
 0x103   :  { %v152_v23 = vadd.f32 %v151_v21, %v101_v20 }
 0x104   :  { %v592_v22 = vpop.f32.mrf.mxu0 }
 0x105   :  { %v158_v27 = vmax.f32 %v152_v23, 0.0 }
 0x106   :  { %v154_v24 = vpop.f32.mrf.mxu0 }
 0x107   :  { %v155_v25 = vadd.f32 %v154_v24, %v101_v20 }
 0x108   :  { %v593_v26 = vpop.f32.mrf.mxu0 }
 0x109   :  { %v159_v28 = vmax.f32 %v155_v25, 0.0 }
 0x10b   :  { %v160_v29 = vpack.c.bf16 %v159_v28, %v158_v27 }
 0x10d   :  { %611 = vmatmul.mubr.bf16.vlgmr.msra.gmra.mxu1 %v160_v29 }
 0x10e   :  { %650 = vmatprep.mubr.msk.bf16.mxu1 %vm826_vm0, %v825_v0  ;;  %635 = vmatpush3.bf16.msra.mxu1 %v682_v33 }
 0x10f   :  { %636 = vmatprep.subr.bf16.mxu1 %v825_v0 }
 0x112   :  { %637 = vmatpush3.bf16.msra.mxu1 %v683_v34 }
 0x113   :  { %638 = vmatprep.subr.bf16.mxu1 %v825_v0 }
 0x116   :  { %639 = vmatpush3.bf16.msra.mxu1 %v684_v35 }
 0x117   :  { %640 = vmatprep.subr.bf16.mxu1 %v825_v0 }
 0x11a   :  { %641 = vmatpush3.bf16.msra.mxu1 %v685_v36 }
 0x11b   :  { %642 = vmatprep.subr.bf16.mxu1 %v825_v0 }
 0x11e   :  { %643 = vmatpush3.bf16.msra.mxu1 %v686_v37 }
 0x11f   :  { %644 = vmatprep.subr.bf16.mxu1 %v825_v0 }
 0x122   :  { %645 = vmatpush3.bf16.msra.mxu1 %v687_v49 }
 0x123   :  { %646 = vmatprep.subr.bf16.mxu1 %v825_v0 }
 0x126   :  { %647 = vmatpush3.bf16.msra.mxu1 %v688_v50 }
 0x127   :  { %648 = vmatprep.subr.bf16.mxu1 %v825_v0  ;;  %v404_v0 = vrot.slane %v921_v19, %v403_v63 }
 0x12a   :  { %649 = vmatpush3.bf16.msra.mxu1 %v689_v51 }
 0x1cd   :  { %v263_v40 = vpop.f32.mrf.mxu1 }
 0x1ce   :  { %v264_v42 = vadd.f32 %v263_v40, %v180_v39 }
 0x1cf   :  { %v612_v41 = vpop.f32.mrf.mxu1 }
 0x1d0   :  { %v270_v46 = vmax.f32 %v264_v42, 0.0 }
 0x1d1   :  { %v266_v43 = vpop.f32.mrf.mxu1 }
 0x1d2   :  { %v267_v44 = vadd.f32 %v266_v43, %v180_v39 }
 0x1d3   :  { %v613_v45 = vpop.f32.mrf.mxu1 }
 0x1d4   :  { %v271_v47 = vmax.f32 %v267_v44, 0.0 }
 0x1d6   :  { %v272_v48 = vpack.c.bf16 %v271_v47, %v270_v46 }
 0x1d8   :  { %631 = vmatmul.mubr.bf16.vlgmr.msra.gmra.mxu0 %v272_v48 }
 0x298   :  { %v375_v54 = vpop.f32.mrf.mxu0 }
 0x299   :  { %v376_v56 = vadd.f32 %v375_v54, %v292_v53 }
 0x29a   :  { %v632_v55 = vpop.f32.mrf.mxu0 }
 0x29b   :  { %v382_v60 = vmax.f32 %v376_v56, 0.0 }
 0x29c   :  { %v378_v57 = vpop.f32.mrf.mxu0 }
 0x29d   :  { %v379_v58 = vadd.f32 %v378_v57, %v292_v53 }
 0x29e   :  { %v633_v59 = vpop.f32.mrf.mxu0 }
 0x29f   :  { %v383_v61 = vmax.f32 %v379_v58, 0.0 }
 0x2a1   :  { %v384_v62 = vpack.c.bf16 %v383_v61, %v382_v60 }
 0x2a3   :  { %651 = vmatmul.mubr.bf16.vlgmr.msra.gmra.mxu1 %v384_v62 }
 0x363   :  { %v487_v1 = vpop.f32.mrf.mxu1 }
 0x364   :  { %v488_v4 = vadd.f32 %v487_v1, %v404_v0 }
 0x365   :  { %v652_v2 = vpop.f32.mrf.mxu1 }
 0x367   :  { %v490_v3 = vpop.f32.mrf.mxu1 }
 0x368   :  { %v491_v5 = vadd.f32 %v490_v3, %v404_v0 }
 0x369   :  { %v653_v6 = vpop.f32.mrf.mxu1 }
 0x36a   :  { %v557_v7 = vpack.c.bf16 %v491_v5, %v488_v4 }
 0x36c   :  { %558 = vst [vmem:[#allocation11] sm:$0xff] %v557_v7  }
 0x36d   :  { %801 = shalt.err (!%p798_p1)
}
 0x36e   :  { %515 = dma.vmem_to_hbm [thread:$0]  %s510_s21, 128, %s953_s6, [#allocation4], %s820_s26, %s820_s26, %s821_s27  }
 0x36f   :  { %816 = dma.done.wait [#allocation4], 128  }
 0x370   :  { %817 = vsyncadd [#allocation4], 4294967168 }
 0x371   :  { %519 = vsyncpa [#allocation3], 1 }
 0x372   :  { %520 = vsyncpa [#allocation6], 1 }
 0x373   :  { %521 = vsyncpa [#allocation9], 1 }
 0x374   :  { %522 = vsyncpa [#allocation4], 1 }

</bundles_post_ra>
